<compile_context>
chip_gen: v6e
topology: v6e:2x2x1
jax: 0.10.0
libtpu: 0.0.40
codegen_flags: <defaults>
</compile_context>

<pallas_src>
import functools

import jax
import jax.numpy as jnp
import numpy as np
from jax import lax
from jax.experimental import pallas as pl
from jax.experimental.pallas import tpu as pltpu


def _fused_kernel(x_ref, xh_ref, w_ref, b_ref, o_ref, *, th2, w2, cin4, cout4):
    """One (batch, row-tile) grid step of the fused conv3x3 + PixelUnshuffle(2).

    x_ref  : (1, th2, Ws, cin4)   main rows of the space-to-depth'd padded input
    xh_ref : (1, 1,  Ws, cin4)    one halo row (s2d row (t+1)*th2; the last tile
                                  reads row H2, which is the zero-pad row)
    w_ref  : (4, cin4, cout4)     fused 2x2 conv weights, tap index = ky*2 + kx
    b_ref  : (1, cout4)           fused bias (conv bias repeated 4x), f32
    o_ref  : (1, cout4, th2*w2)   NCHW output tile, spatial flattened (lane-dense)
    """
    m1 = (th2 - 1) * w2

    x = x_ref[0]          # (th2, Ws, cin4)
    xh = xh_ref[0, 0]     # (Ws, cin4)

    # Column (kx) views; Ws = w2 + 1, so both slices are in-bounds.
    x_c0, x_c1 = x[:, 0:w2, :], x[:, 1:w2 + 1, :]
    xh_c0, xh_c1 = xh[0:w2, :], xh[1:w2 + 1, :]

    w00, w01, w10, w11 = w_ref[0], w_ref[1], w_ref[2], w_ref[3]
    b = b_ref[...]        # (1, cout4), f32

    def mm(p, w):
        return jnp.dot(p, w, preferred_element_type=jnp.float32)

    # Output rows 0 .. th2-2:
    #   ky=0 taps read main rows 0..th2-2, ky=1 taps read main rows 1..th2-1.
    if th2 > 1:
        top = (mm(x_c0[:th2 - 1].reshape(m1, cin4), w00)
               + mm(x_c1[:th2 - 1].reshape(m1, cin4), w01)
               + mm(x_c0[1:].reshape(m1, cin4), w10)
               + mm(x_c1[1:].reshape(m1, cin4), w11)
               + b)
        # 2-D transpose (XLU) -> (cout4, m1), store lane-dense into the NCHW tile.
        o_ref[0, :, 0:m1] = jnp.transpose(top).astype(o_ref.dtype)

    # Output row th2-1:
    #   ky=0 taps read main row th2-1, ky=1 taps read the halo row.
    bot = (mm(x_c0[th2 - 1], w00)
           + mm(x_c1[th2 - 1], w01)
           + mm(xh_c0, w10)
           + mm(xh_c1, w11)
           + b)
    o_ref[0, :, m1:th2 * w2] = jnp.transpose(bot).astype(o_ref.dtype)


def _fused_weights(weight_oihw, bias, compute_dtype):
    """Torch conv weight (Cout, Cin, 3, 3) -> fused 2x2 weight (4, 4*Cin, 4*Cout).

    Wf[ky*2+kx, (iy*2+jx)*Cin + cin, c*4 + i*2 + j]
        = w[c, cin, (2*ky+iy) - i, (2*kx+jx) - j]   (zero outside the 3x3 window)
    """
    cout, cin = int(weight_oihw.shape[0]), int(weight_oihw.shape[1])
    w_hwio = jnp.transpose(weight_oihw, (2, 3, 1, 0))          # (3, 3, Cin, Cout)
    rows = []
    for i in (0, 1):
        cols = []
        for j in (0, 1):
            cols.append(jnp.pad(w_hwio, ((i, 1 - i), (j, 1 - j), (0, 0), (0, 0))))
        rows.append(jnp.stack(cols, axis=0))
    w4 = jnp.stack(rows, axis=0)                               # (i, j, 4, 4, Cin, Cout)
    w4 = w4.reshape(2, 2, 2, 2, 2, 2, cin, cout)               # (i, j, ky, iy, kx, jx, Cin, Cout)
    wf = jnp.transpose(w4, (2, 4, 3, 5, 6, 7, 0, 1))           # (ky, kx, iy, jx, Cin, Cout, i, j)
    w_mat = wf.reshape(4, 4 * cin, 4 * cout).astype(compute_dtype)
    b4 = jnp.repeat(bias, 4).reshape(1, 4 * cout).astype(jnp.float32)
    return w_mat, b4


def _vmem_budget_and_limit():
    """Generation-aware VMEM limit/budget (v5e/v6e: 128 MiB parts, v7x: 64 MiB)."""
    cap = 64 * 1024 * 1024
    try:
        cap = int(pltpu.get_tpu_info().vmem_capacity_bytes)
    except Exception:
        pass
    limit = 64 * 1024 * 1024 if cap >= 128 * 1024 * 1024 else 32 * 1024 * 1024
    return limit // 2, limit          # (picker budget with headroom, vmem_limit_bytes)


def _pick_block_h2(h2, w2, ws, cin4, cout4, in_isz, out_isz, budget_bytes, batch):
    """Largest legal divisor of h2 whose per-step working set fits the budget."""

    def vmem_bytes(th2):
        inp = 2 * (th2 + 1) * ws * cin4 * in_isz        # main + halo, double-buffered
        outp = 2 * th2 * w2 * cout4 * out_isz           # output, double-buffered
        wgt = 2 * (4 * cin4 * cout4 * in_isz + cout4 * 4)
        tmp = 4 * th2 * w2 * cout4 * 4                  # f32 dot results + transposed copy
        tmp += 2 * th2 * w2 * cin4 * in_isz             # sliced patch temporaries
        return inp + outp + wgt + tmp

    # Output-tile legality: last block dim th2*W2 must be a multiple of 128 lanes
    # or equal the full H2*W2 extent (th2 == h2).
    cands = [d for d in range(1, h2 + 1)
             if h2 % d == 0 and (d == h2 or (d * w2) % 128 == 0)]
    fits = [d for d in cands if vmem_bytes(d) <= budget_bytes]
    pool = fits if fits else cands[:1]                  # fall back to smallest legal tile
    best = max(pool)
    # Megacore balance: with batch == 1 prefer >= 2 row tiles when a smaller
    # legal tile also fits, so both v7x TensorCores get work.
    if batch == 1 and best == h2:
        smaller = [d for d in pool if d < h2]
        if smaller:
            best = max(smaller)
    return best


@functools.partial(jax.jit, static_argnames=("block_h2", "compute_dtype"))
def downsample_forward(x_nchw, weight_oihw, bias, *, block_h2=None,
                       compute_dtype=jnp.bfloat16):
    """Exact equivalent of Downsample(n_feat).forward for NCHW input (-> NCHW output).

    Default path uses bf16 MXU operands (f32 accumulation); pass
    compute_dtype=jnp.float32 for the un-quantized path.
    """
    B, Cin, H, W = x_nchw.shape
    Cout = int(weight_oihw.shape[0])                 # n_feat // 2
    assert int(weight_oihw.shape[1]) == Cin
    assert H % 2 == 0 and W % 2 == 0, "PixelUnshuffle(2) requires even H, W"
    assert (W // 2) % 8 == 0, "this kernel requires W % 16 == 0 (sublane alignment)"

    out_dtype = x_nchw.dtype
    H2, W2 = H // 2, W // 2
    Hs, Ws = H2 + 1, W2 + 1
    cin4, cout4 = 4 * Cin, 4 * Cout

    # ---- input layout pass (single fused XLA pass over x) -------------------
    # zero-pad spatially, then space-to-depth(2) so the kernel sees 4*Cin lanes:
    #   xs2d[b, h', w', (iy*2 + jx)*Cin + cin] = x_pad[b, cin, 2*h' + iy, 2*w' + jx]
    xp = jnp.pad(x_nchw, ((0, 0), (0, 0), (1, 1), (1, 1)))
    xs2d = xp.reshape(B, Cin, Hs, 2, Ws, 2)
    xs2d = jnp.transpose(xs2d, (0, 2, 4, 3, 5, 1)).reshape(B, Hs, Ws, cin4)
    xs2d = xs2d.astype(compute_dtype)

    w_mat, b4 = _fused_weights(weight_oihw, bias, compute_dtype)

    # ---- row tiling ----------------------------------------------------------
    budget, vmem_limit = _vmem_budget_and_limit()
    in_isz = jnp.dtype(compute_dtype).itemsize
    out_isz = jnp.dtype(out_dtype).itemsize
    if block_h2 is None:
        block_h2 = _pick_block_h2(H2, W2, Ws, cin4, cout4, in_isz, out_isz,
                                  budget, B)
    assert H2 % block_h2 == 0, f"block_h2={block_h2} must divide H//2={H2}"
    assert block_h2 == H2 or (block_h2 * W2) % 128 == 0, \
        "output tile must be a multiple of 128 lanes or the full row extent"
    n_tiles = H2 // block_h2

    kernel = functools.partial(_fused_kernel, th2=block_h2, w2=W2,
                               cin4=cin4, cout4=cout4)

    out_flat = pl.pallas_call(
        kernel,
        # NCHW output with the spatial dims pre-flattened; the reshape below is free.
        out_shape=jax.ShapeDtypeStruct((B, cout4, H2 * W2), out_dtype),
        grid_spec=pltpu.PrefetchScalarGridSpec(
            num_scalar_prefetch=0,
            grid=(B, n_tiles),
            in_specs=[
                # main rows [t*block_h2, (t+1)*block_h2) of the s2d input
                pl.BlockSpec((1, block_h2, Ws, cin4), lambda b, t: (b, t, 0, 0)),
                # 1-row halo: s2d row (t+1)*block_h2 (block size 1 -> block idx == row idx);
                # the last tile reads row H2, which exists because of the +1 pad row.
                pl.BlockSpec((1, 1, Ws, cin4),
                             lambda b, t: (b, (t + 1) * block_h2, 0, 0)),
                # weights / bias: constant index maps -> fetched once, stay resident
                pl.BlockSpec((4, cin4, cout4), lambda b, t: (0, 0, 0)),
                pl.BlockSpec((1, cout4), lambda b, t: (0, 0)),
            ],
            out_specs=pl.BlockSpec((1, cout4, block_h2 * W2),
                                   lambda b, t: (b, 0, t)),
        ),
        compiler_params=pltpu.CompilerParams(
            # both grid axes independent -> shard across both v7x TensorCores
            dimension_semantics=("parallel", "parallel"),
            vmem_limit_bytes=vmem_limit,
        ),
    )(xs2d, xs2d, w_mat, b4)

    # Free metadata reshape: (B, cout4, H2*W2) row-major == (B, cout4, H2, W2).
    return out_flat.reshape(B, cout4, H2, W2)


def _reference(x_nchw, weight_oihw, bias):
    """Pure-JAX reference (lax conv + pixel-unshuffle) for correctness checks."""
    conv = lax.conv_general_dilated(
        x_nchw, weight_oihw, window_strides=(1, 1), padding=((1, 1), (1, 1)),
        dimension_numbers=("NCHW", "OIHW", "NCHW"))
    conv = conv + bias.reshape(1, -1, 1, 1)
    B, C, H, W = conv.shape
    y = conv.reshape(B, C, H // 2, 2, W // 2, 2)
    y = jnp.transpose(y, (0, 1, 3, 5, 2, 4))
    return y.reshape(B, C * 4, H // 2, W // 2)


if __name__ == "__main__":
    key = jax.random.PRNGKey(0)
    k_x, k_w, k_b = jax.random.split(key, 3)

    n_feat = 4
    Cout = n_feat // 2

    weight = jax.random.normal(k_w, (Cout, n_feat, 3, 3), dtype=jnp.float32)
    weight = weight * (1.0 / np.sqrt(n_feat * 9))
    bias = jax.random.normal(k_b, (Cout,), dtype=jnp.float32) * 0.5

    # ---- multi-row-tile config (exercises the halo-row path) ----------------
    B, H, W = 2, 32, 32
    x = jax.random.normal(k_x, (B, n_feat, H, W), dtype=jnp.float32)
    ref = jax.block_until_ready(_reference(x, weight, bias))

    out_f32 = jax.block_until_ready(
        downsample_forward(x, weight, bias, block_h2=8,
                           compute_dtype=jnp.float32))
    assert out_f32.shape == (B, 2 * n_feat, H // 2, W // 2), out_f32.shape
    # Tolerance covers the implementation-defined MXU f32 matmul pass count in
    # either the kernel or the XLA reference conv; structural bugs are O(1).
    np.testing.assert_allclose(np.asarray(out_f32), np.asarray(ref),
                               rtol=2e-2, atol=2e-2)

    # ---- default path: bf16 MXU operands, f32 accumulation, auto tiling -----
    Bs, Hsm, Wsm = 2, 16, 16
    x_small = jax.random.normal(k_x, (Bs, n_feat, Hsm, Wsm), dtype=jnp.float32)
    ref_small = jax.block_until_ready(_reference(x_small, weight, bias))

    out_bf16 = jax.block_until_ready(downsample_forward(x_small, weight, bias))
    assert out_bf16.shape == (Bs, 2 * n_feat, Hsm // 2, Wsm // 2), out_bf16.shape
    np.testing.assert_allclose(np.asarray(out_bf16), np.asarray(ref_small),
                               rtol=5e-2, atol=5e-2)

    print("KERNEL_OK")
</pallas_src>

<mosaic_0001>
module attributes {stable_mosaic.version = 11 : i64} {
  func.func @_fused_kernel(%arg0: i32, %arg1: i32, %arg2: memref<1x8x17x16xf32, #tpu.memory_space<vmem>>, %arg3: memref<1x1x17x16xf32, #tpu.memory_space<vmem>>, %arg4: memref<4x16x8xf32, #tpu.memory_space<vmem>>, %arg5: memref<1x8xf32, #tpu.memory_space<vmem>>, %arg6: memref<1x8x128xf32, #tpu.memory_space<vmem>>) attributes {dimension_semantics = [#tpu.dimension_semantics<parallel>, #tpu.dimension_semantics<parallel>], iteration_bounds = array<i64: 2, 2>, scalar_prefetch = 0 : i64, scratch_operands = 0 : i64, tpu.core_type = #tpu.core_type<tc>, window_params = [{transform_indices = @transform_0, window_bounds = array<i64: 1, 8, 17, 16>}, {transform_indices = @transform_1, window_bounds = array<i64: 1, 1, 17, 16>}, {pipeline_mode = #tpu.pipeline_mode<synchronous>, transform_indices = @transform_2, window_bounds = array<i64: 4, 16, 8>}, {pipeline_mode = #tpu.pipeline_mode<synchronous>, transform_indices = @transform_3, window_bounds = array<i64: 1, 8>}, {transform_indices = @transform_4, window_bounds = array<i64: 1, 8, 128>}]} {
    %c0 = arith.constant 0 : index
    %c0_0 = arith.constant 0 : index
    %c0_1 = arith.constant 0 : index
    %c0_2 = arith.constant 0 : index
    %0 = vector.load %arg2[%c0, %c0_0, %c0_1, %c0_2] : memref<1x8x17x16xf32, #tpu.memory_space<vmem>>, vector<1x8x17x16xf32>
    %1 = vector.shape_cast %0 : vector<1x8x17x16xf32> to vector<8x17x16xf32>
    %c0_3 = arith.constant 0 : index
    %c0_4 = arith.constant 0 : index
    %c0_5 = arith.constant 0 : index
    %c0_6 = arith.constant 0 : index
    %2 = vector.load %arg3[%c0_3, %c0_4, %c0_5, %c0_6] : memref<1x1x17x16xf32, #tpu.memory_space<vmem>>, vector<1x1x17x16xf32>
    %3 = vector.shape_cast %2 : vector<1x1x17x16xf32> to vector<17x16xf32>
    %4 = vector.extract_strided_slice %1 {offsets = [0, 0, 0], sizes = [8, 16, 16], strides = [1, 1, 1]} : vector<8x17x16xf32> to vector<8x16x16xf32>
    %5 = vector.extract_strided_slice %1 {offsets = [0, 1, 0], sizes = [8, 16, 16], strides = [1, 1, 1]} : vector<8x17x16xf32> to vector<8x16x16xf32>
    %6 = vector.extract_strided_slice %3 {offsets = [0, 0], sizes = [16, 16], strides = [1, 1]} : vector<17x16xf32> to vector<16x16xf32>
    %7 = vector.extract_strided_slice %3 {offsets = [1, 0], sizes = [16, 16], strides = [1, 1]} : vector<17x16xf32> to vector<16x16xf32>
    %c0_7 = arith.constant 0 : index
    %c0_8 = arith.constant 0 : index
    %c0_9 = arith.constant 0 : index
    %8 = vector.load %arg4[%c0_7, %c0_8, %c0_9] : memref<4x16x8xf32, #tpu.memory_space<vmem>>, vector<1x16x8xf32>
    %9 = vector.shape_cast %8 : vector<1x16x8xf32> to vector<16x8xf32>
    %c1 = arith.constant 1 : index
    %c0_10 = arith.constant 0 : index
    %c0_11 = arith.constant 0 : index
    %10 = vector.load %arg4[%c1, %c0_10, %c0_11] : memref<4x16x8xf32, #tpu.memory_space<vmem>>, vector<1x16x8xf32>
    %11 = vector.shape_cast %10 : vector<1x16x8xf32> to vector<16x8xf32>
    %c2 = arith.constant 2 : index
    %c0_12 = arith.constant 0 : index
    %c0_13 = arith.constant 0 : index
    %12 = vector.load %arg4[%c2, %c0_12, %c0_13] : memref<4x16x8xf32, #tpu.memory_space<vmem>>, vector<1x16x8xf32>
    %13 = vector.shape_cast %12 : vector<1x16x8xf32> to vector<16x8xf32>
    %c3 = arith.constant 3 : index
    %c0_14 = arith.constant 0 : index
    %c0_15 = arith.constant 0 : index
    %14 = vector.load %arg4[%c3, %c0_14, %c0_15] : memref<4x16x8xf32, #tpu.memory_space<vmem>>, vector<1x16x8xf32>
    %15 = vector.shape_cast %14 : vector<1x16x8xf32> to vector<16x8xf32>
    %c0_16 = arith.constant 0 : index
    %c0_17 = arith.constant 0 : index
    %16 = vector.load %arg5[%c0_16, %c0_17] : memref<1x8xf32, #tpu.memory_space<vmem>>, vector<1x8xf32>
    %17 = vector.extract_strided_slice %4 {offsets = [0, 0, 0], sizes = [7, 16, 16], strides = [1, 1, 1]} : vector<8x16x16xf32> to vector<7x16x16xf32>
    %18 = vector.shape_cast %17 : vector<7x16x16xf32> to vector<112x16xf32>
    %cst = arith.constant dense<0.000000e+00> : vector<112x8xf32>
    %19 = tpu.matmul %18, %9, %cst {dimension_numbers = #tpu.dot_dimension_numbers<[1], [0], [0], [1], [0, 0, 1, 1], [], []>} : vector<112x16xf32>, vector<16x8xf32>, vector<112x8xf32> -> vector<112x8xf32>
    %20 = vector.extract_strided_slice %5 {offsets = [0, 0, 0], sizes = [7, 16, 16], strides = [1, 1, 1]} : vector<8x16x16xf32> to vector<7x16x16xf32>
    %21 = vector.shape_cast %20 : vector<7x16x16xf32> to vector<112x16xf32>
    %cst_18 = arith.constant dense<0.000000e+00> : vector<112x8xf32>
    %22 = tpu.matmul %21, %11, %cst_18 {dimension_numbers = #tpu.dot_dimension_numbers<[1], [0], [0], [1], [0, 0, 1, 1], [], []>} : vector<112x16xf32>, vector<16x8xf32>, vector<112x8xf32> -> vector<112x8xf32>
    %23 = arith.addf %19, %22 : vector<112x8xf32>
    %24 = vector.extract_strided_slice %4 {offsets = [1, 0, 0], sizes = [7, 16, 16], strides = [1, 1, 1]} : vector<8x16x16xf32> to vector<7x16x16xf32>
    %25 = vector.shape_cast %24 : vector<7x16x16xf32> to vector<112x16xf32>
    %cst_19 = arith.constant dense<0.000000e+00> : vector<112x8xf32>
    %26 = tpu.matmul %25, %13, %cst_19 {dimension_numbers = #tpu.dot_dimension_numbers<[1], [0], [0], [1], [0, 0, 1, 1], [], []>} : vector<112x16xf32>, vector<16x8xf32>, vector<112x8xf32> -> vector<112x8xf32>
    %27 = arith.addf %23, %26 : vector<112x8xf32>
    %28 = vector.extract_strided_slice %5 {offsets = [1, 0, 0], sizes = [7, 16, 16], strides = [1, 1, 1]} : vector<8x16x16xf32> to vector<7x16x16xf32>
    %29 = vector.shape_cast %28 : vector<7x16x16xf32> to vector<112x16xf32>
    %cst_20 = arith.constant dense<0.000000e+00> : vector<112x8xf32>
    %30 = tpu.matmul %29, %15, %cst_20 {dimension_numbers = #tpu.dot_dimension_numbers<[1], [0], [0], [1], [0, 0, 1, 1], [], []>} : vector<112x16xf32>, vector<16x8xf32>, vector<112x8xf32> -> vector<112x8xf32>
    %31 = arith.addf %27, %30 : vector<112x8xf32>
    %32 = vector.broadcast %16 : vector<1x8xf32> to vector<112x8xf32>
    %33 = arith.addf %31, %32 : vector<112x8xf32>
    %34 = tpu.transpose %33, [1, 0] : vector<112x8xf32> -> vector<8x112xf32>
    %c0_21 = arith.constant 0 : index
    %c0_22 = arith.constant 0 : index
    %c0_23 = arith.constant 0 : index
    %35 = vector.load %arg6[%c0_21, %c0_22, %c0_23] : memref<1x8x128xf32, #tpu.memory_space<vmem>>, vector<1x8x112xf32>
    %36 = vector.shape_cast %35 : vector<1x8x112xf32> to vector<8x112xf32>
    %37 = vector.shape_cast %34 : vector<8x112xf32> to vector<1x8x112xf32>
    tpu.vector_store %arg6[%c0_21, %c0_22, %c0_23], %37 {strides = array<i32>} : memref<1x8x128xf32, #tpu.memory_space<vmem>>, vector<1x8x112xf32>,
    %38 = vector.extract_strided_slice %4 {offsets = [7, 0, 0], sizes = [1, 16, 16], strides = [1, 1, 1]} : vector<8x16x16xf32> to vector<1x16x16xf32>
    %39 = vector.shape_cast %38 : vector<1x16x16xf32> to vector<16x16xf32>
    %cst_24 = arith.constant dense<0.000000e+00> : vector<16x8xf32>
    %40 = tpu.matmul %39, %9, %cst_24 {dimension_numbers = #tpu.dot_dimension_numbers<[1], [0], [0], [1], [0, 0, 1, 1], [], []>} : vector<16x16xf32>, vector<16x8xf32>, vector<16x8xf32> -> vector<16x8xf32>
    %41 = vector.extract_strided_slice %5 {offsets = [7, 0, 0], sizes = [1, 16, 16], strides = [1, 1, 1]} : vector<8x16x16xf32> to vector<1x16x16xf32>
    %42 = vector.shape_cast %41 : vector<1x16x16xf32> to vector<16x16xf32>
    %cst_25 = arith.constant dense<0.000000e+00> : vector<16x8xf32>
    %43 = tpu.matmul %42, %11, %cst_25 {dimension_numbers = #tpu.dot_dimension_numbers<[1], [0], [0], [1], [0, 0, 1, 1], [], []>} : vector<16x16xf32>, vector<16x8xf32>, vector<16x8xf32> -> vector<16x8xf32>
    %44 = arith.addf %40, %43 : vector<16x8xf32>
    %cst_26 = arith.constant dense<0.000000e+00> : vector<16x8xf32>
    %45 = tpu.matmul %6, %13, %cst_26 {dimension_numbers = #tpu.dot_dimension_numbers<[1], [0], [0], [1], [0, 0, 1, 1], [], []>} : vector<16x16xf32>, vector<16x8xf32>, vector<16x8xf32> -> vector<16x8xf32>
    %46 = arith.addf %44, %45 : vector<16x8xf32>
    %cst_27 = arith.constant dense<0.000000e+00> : vector<16x8xf32>
    %47 = tpu.matmul %7, %15, %cst_27 {dimension_numbers = #tpu.dot_dimension_numbers<[1], [0], [0], [1], [0, 0, 1, 1], [], []>} : vector<16x16xf32>, vector<16x8xf32>, vector<16x8xf32> -> vector<16x8xf32>
    %48 = arith.addf %46, %47 : vector<16x8xf32>
    %49 = vector.broadcast %16 : vector<1x8xf32> to vector<16x8xf32>
    %50 = arith.addf %48, %49 : vector<16x8xf32>
    %51 = tpu.transpose %50, [1, 0] : vector<16x8xf32> -> vector<8x16xf32>
    %c0_28 = arith.constant 0 : index
    %c0_29 = arith.constant 0 : index
    %c112 = arith.constant 112 : index
    %52 = vector.load %arg6[%c0_28, %c0_29, %c112] : memref<1x8x128xf32, #tpu.memory_space<vmem>>, vector<1x8x16xf32>
    %53 = vector.shape_cast %52 : vector<1x8x16xf32> to vector<8x16xf32>
    %54 = vector.shape_cast %51 : vector<8x16xf32> to vector<1x8x16xf32>
    tpu.vector_store %arg6[%c0_28, %c0_29, %c112], %54 {strides = array<i32>} : memref<1x8x128xf32, #tpu.memory_space<vmem>>, vector<1x8x16xf32>,
    return
  }
  func.func @transform_0(%arg0: i32, %arg1: i32) -> (i32, i32, i32, i32) {
    %c0_i32 = arith.constant 0 : i32
    %c0_i32_0 = arith.constant 0 : i32
    %c0_i32_1 = arith.constant 0 : i32
    return %arg0, %arg1, %c0_i32, %c0_i32_0 : i32, i32, i32, i32
  }
  func.func @transform_1(%arg0: i32, %arg1: i32) -> (i32, i32, i32, i32) {
    %c1_i32 = arith.constant 1 : i32
    %0 = arith.addi %arg1, %c1_i32 : i32
    %c8_i32 = arith.constant 8 : i32
    %1 = arith.muli %0, %c8_i32 : i32
    %c0_i32 = arith.constant 0 : i32
    %c0_i32_0 = arith.constant 0 : i32
    %c0_i32_1 = arith.constant 0 : i32
    return %arg0, %1, %c0_i32, %c0_i32_0 : i32, i32, i32, i32
  }
  func.func @transform_2(%arg0: i32, %arg1: i32) -> (i32, i32, i32) {
    %c0_i32 = arith.constant 0 : i32
    %c0_i32_0 = arith.constant 0 : i32
    %c0_i32_1 = arith.constant 0 : i32
    %c0_i32_2 = arith.constant 0 : i32
    return %c0_i32, %c0_i32_0, %c0_i32_1 : i32, i32, i32
  }
  func.func @transform_3(%arg0: i32, %arg1: i32) -> (i32, i32) {
    %c0_i32 = arith.constant 0 : i32
    %c0_i32_0 = arith.constant 0 : i32
    %c0_i32_1 = arith.constant 0 : i32
    return %c0_i32, %c0_i32_0 : i32, i32
  }
  func.func @transform_4(%arg0: i32, %arg1: i32) -> (i32, i32, i32) {
    %c0_i32 = arith.constant 0 : i32
    %c0_i32_0 = arith.constant 0 : i32
    return %arg0, %c0_i32, %arg1 : i32, i32, i32
  }
}

</mosaic_0001>

<bundles_post_ra>
// kernel: downsample_forward.1
= control target key start
LH: loop header
LB: loop body
LE: loop exit
PB: predicated region body
PF: predicated region fallthrough
CT: control target
= control target key end

     0   :  { %s1982_s15 = smov 0   ;;  %s1984_s16 = smov 0   ;;  %s2351_s0 = inlined_call_operand.vmem [shape: f32[2,17,17,16], index: 0, kind: input, shape index: {}, may-alias: {0,1}]   ;;  %s2352_s1 = inlined_call_operand.vmem [shape: f32[2,17,17,16], index: 1, kind: input, shape index: {}, may-alias: {0,1}]   ;;  %s2353_s2 = inlined_call_operand.vmem [shape: f32[4,16,8], index: 2, kind: input, shape index: {}]   ;;  %s2354_s3 = inlined_call_operand.vmem [shape: f32[1,8], index: 3, kind: input, shape index: {}]   ;;  %s2355_s4 = inlined_call_operand.vmem [shape: f32[2,8,256], index: 4, kind: output, shape index: {}]  }
   0x1   :  { %s1986_s17 = smov 0   ;;  %s1988_s18 = smov 0  }
   0x2   :  { %s1990_s19 = smov 0  }
   0x3 LB: > { %s23_s20 = sadd.s32 1, %s1946_s17  ;;  %s26_s21 = sadd.s32 1, %s1950_s18  ;;  %s1954_s19 = sphi %s1990_s19, %s14_s19   ;;  %s1950_s18 = sphi %s1988_s18, %s2359_s18   ;;  %s1946_s17 = sphi %s1986_s17, %s2358_s17   ;;  %s1942_s16 = sphi %s1984_s16, %s2357_s16   ;;  %s1938_s15 = sphi %s1982_s15, %s2356_s15  }
   0x4   : > { %p24_p0 = scmp.ge.s32.totalorder %s23_s20, 2  ;;  %p1577_p1 = scmp.ge.s32.totalorder %s1954_s19, 1 }
   0x5   : > { %p218_p2 = scmp.lt.s32.totalorder %s1954_s19, 5 }
   0x6   : > { %s2361_s20 = smov (%p24_p0, %s23_s20), 0  ;;  %s2363_s21 = smov (!%p24_p0, %s26_s21), %s1950_s18 }
   0x7   : > { %p219_p3 = pnand %p1577_p1, %p218_p2  ;;  %p28_p4 = scmp.ge.s32.totalorder %s2363_s21, 2 }
   0x8   : > { %s2030_s28 = sshll.u32 (!%p219_p3), %s1938_s15, 3  ;;  %p274_p5 = scmp.lt.s32.totalorder (!%p219_p3), %s1942_s16, 1 }
   0x9   : > { %s2365_s21 = smov (%p28_p4, %s2363_s21), 0  ;;  %222 = sbr.rel (%p219_p3) target bundleno = 581 (0x245), region = 36 }
   0xa   : > { %p276_p6 = scmp.lt.s32.totalorder (!%p219_p3), %s2030_s28, 16  ;;  %s1662_s29 = sadd.s32 (!%p219_p3), 8, %s2030_s28 }
   0xb   : > { %p293_p7 = scmp.lt.s32.totalorder (!%p219_p3), %s1662_s29, 16  ;;  %p304_p8 = scmp.lt.s32.totalorder (!%p219_p3), %s1938_s15, 1 }
   0xe   : > { %v2017_v0 = vld [vmem:[%s2353_s2 + $0x18] sm:$0xff]  ;;  %v2022_v1 = vld [vmem:[%s2353_s2 + $0x8] sm:$0xff]  ;;  %v2027_v2 = vld [vmem:[%s2353_s2 + $0x10] sm:$0xff]  ;;  %s2367_s16 = smov (!%p274_p5, %s1942_s16), 1  ;;  %vm406_vm0 = vcmask 130048   ;;  %vm370_vm1 = vcmask 1046528  }
   0xf   : > { %1743 = vmatprep.subr.mxu0 %v2017_v0  ;;  %1768 = vmatprep.subr.mxu1 %v2022_v1  ;;  %v2037_v3 = vld [vmem:[%s2353_s2] sm:$0xff]  ;;  %v2047_v4 = vld [vmem:[%s2353_s2 + $0x28] sm:$0xff]  ;;  %v2052_v5 = vld [vmem:[%s2353_s2 + $0x38] sm:$0xff]  ;;  %s277_s9 = scalar_select %p276_p6, %s2030_s28, 16  ;;  %vm1099_vm2 = vcmask 916480   ;;  %vm1459_vm3 = vcmask 1048448  }
  0x10   : > { %1744 = vmatpush3.msra.mxu0 %v2017_v0  ;;  %1769 = vmatpush3.msra.mxu1 %v2022_v1  ;;  %s1872_s10 = smul.u32 51, %s2367_s16  ;;  %v2072_v6 = vld [vmem:[%s2353_s2 + $0x30] sm:$0xff]  ;;  %v2115_v29 = vld [vmem:[%s2353_s2 + $0x20] sm:$0xff]  ;;  %s2369_s29 = smov (!%p293_p7, %s1662_s29), 16 }
  0x11   : > { %1745 = vmatprep.subr.mxu0 %v2027_v2  ;;  %1770 = vmatprep.subr.mxu1 %v2037_v3  ;;  %s1871_s11 = smul.u32 3, %s277_s9  ;;  %s2371_s15 = smov (!%p304_p8, %s1938_s15), 1 }
  0x12   : > { %1746 = vmatpush3.msra.mxu0 %v2027_v2  ;;  %1771 = vmatpush3.msra.mxu1 %v2037_v3  ;;  %s1873_s28 = smul.u32 3, %s2369_s29 }
  0x13   : > { %1793 = vmatprep.subr.mxu0 %v2047_v4  ;;  %1818 = vmatprep.subr.mxu1 %v2052_v5  ;;  %s280_s12 = sadd.s32 %s1872_s10, %s1871_s11  ;;  %s1956_s11 = smov 112  }
  0x14   : > { %s1579_s13 = sshll.u32 %s280_s12, 3  ;;  %s297_s30 = sadd.s32 %s1873_s28, %s1872_s10 }
  0x15   : > { %s2067_s23 = scalar_lea.vmem %s2351_s0, %s1579_s13  ;;  %s1581_s5 = sshll.u32 %s297_s30, 3 }
  0x16   : > { %v310_v7 = vld [vmem:[%s2067_s23] sm:$0xff]  ;;  %v311_v8 = vld [vmem:[%s2067_s23 + $0x8] sm:$0xff]  ;;  %v312_v9 = vld [vmem:[%s2067_s23 + $0x10] sm:$0x1]  ;;  %s299_s8 = scalar_lea.vmem %s2352_s1, %s1581_s5  ;;  %s1582_s12 = sshll.u32 %s2367_s16, 1 }
  0x17   : > { %v371_v10 = vrot.slane %v310_v7, 1  ;;  %v372_v11 = vrot.slane %v311_v8, 1  ;;  %1772 = vmatprep.mubr.msk.f32.mxu1 %vm406_vm0, %v310_v7  ;;  %v374_v12 = vrot.slane %v312_v9, 1  ;;  %v2079_v13 = vld [vmem:[%s2067_s23 + $0x18] sm:$0xff]  ;;  %v2082_v14 = vld [vmem:[%s2067_s23 + $0x20] sm:$0xff]  ;;  %v2085_v15 = vld [vmem:[%s2067_s23 + $0x30] sm:$0xff]  ;;  %s307_s13 = sadd.s32 %s1582_s12, %s2371_s15 }
  0x18   : > { %1773 = vmatmul.mubr.msk.f32.vlgmr.msra.gmra.mxu1 %vm406_vm0, %v311_v8  ;;  %v376_v16 = vrot.slane %v2079_v13, 1  ;;  %v377_v17 = vrot.slane %v2082_v14, 1  ;;  %v315_v18 = vld [vmem:[%s2067_s23 + $0x28] sm:$0x1]  ;;  %v2092_v19 = vld [vmem:[%s2067_s23 + $0x38] sm:$0xff]  ;;  %v381_v20 = vrot.slane %v2085_v15, 1 }
  0x19   : > { %v373_v21 = vsel %vm370_vm1, %v371_v10, %v372_v11  ;;  %v375_v22 = vsel %vm370_vm1, %v372_v11, %v374_v12  ;;  %1819 = vmatpush3.msra.mxu1 %v2052_v5  ;;  %1775 = vmatprep.mubr.msk.f32.mxu1 %vm406_vm0, %v2079_v13  ;;  %v379_v23 = vrot.slane %v315_v18, 1  ;;  %v382_v24 = vrot.slane %v2092_v19, 1  ;;  %v318_v25 = vld [vmem:[%s2067_s23 + $0x40] sm:$0x1]  ;;  %v2107_v27 = vld [vmem:[%s2067_s23 + $0x48] sm:$0xff]  ;;  %v2110_v28 = vld [vmem:[%s2067_s23 + $0x50] sm:$0xff] }
  0x1a   : > { %1747 = vmatprep.mubr.msk.f32.mxu0 %vm406_vm0, %v373_v21  ;;  %v2104_v26 = vsel %vm370_vm1, %v376_v16, %v377_v17  ;;  %1820 = vmatprep.subr.mxu1 %v2072_v6  ;;  %v384_v31 = vrot.slane %v318_v25, 1  ;;  %v386_v33 = vrot.slane %v2107_v27, 1  ;;  %v387_v34 = vrot.slane %v2110_v28, 1  ;;  %v321_v35 = vld [vmem:[%s2067_s23 + $0x58] sm:$0x1]  ;;  %v2139_v36 = vld [vmem:[%s2067_s23 + $0x60] sm:$0xff] }
  0x1b   : > { %1748 = vmatmul.mubr.msk.f32.vlgmr.msra.gmra.mxu0 %vm406_vm0, %v375_v22  ;;  %1821 = vmatpush3.msra.mxu1 %v2072_v6  ;;  %v2124_v30 = vsel %vm370_vm1, %v377_v17, %v379_v23  ;;  %v2129_v32 = vsel %vm370_vm1, %v381_v20, %v382_v24  ;;  %v2142_v37 = vld [vmem:[%s2067_s23 + $0x68] sm:$0xff]  ;;  %v389_v39 = vrot.slane %v321_v35, 1  ;;  %v391_v41 = vrot.slane %v2139_v36, 1  ;;  %v324_v43 = vld [vmem:[%s2067_s23 + $0x70] sm:$0x1]  ;;  %v2160_v44 = vld [vmem:[%s2067_s23 + $0x78] sm:$0xff] }
  0x1c   : > { %1794 = vmatpush3.msra.mxu0 %v2047_v4  ;;  %1750 = vmatprep.mubr.msk.f32.mxu0 %vm406_vm0, %v2104_v26  ;;  %v385_v38 = vsel %vm370_vm1, %v382_v24, %v384_v31  ;;  %v388_v40 = vsel %vm370_vm1, %v386_v33, %v387_v34  ;;  %v392_v42 = vrot.slane %v2142_v37, 1  ;;  %v2163_v45 = vld [vmem:[%s2067_s23 + $0x80] sm:$0xff]  ;;  %v394_v47 = vrot.slane %v324_v43, 1  ;;  %v327_v51 = vld [vmem:[%s2067_s23 + $0x88] sm:$0x1]  ;;  %v2177_v52 = vld [vmem:[%s2067_s23 + $0x90] sm:$0xff] }
  0x1d   : > { %1776 = vmatmul.mubr.msk.f32.gmra.mxu1 %vm406_vm0, %v2082_v14  ;;  %1795 = vmatprep.subr.mxu0 %v2115_v29  ;;  %v390_v46 = vsel %vm370_vm1, %v387_v34, %v389_v39  ;;  %v396_v49 = vrot.slane %v2160_v44, 1  ;;  %v397_v50 = vrot.slane %v2163_v45, 1  ;;  %v2180_v53 = vld [vmem:[%s2067_s23 + $0x98] sm:$0xff]  ;;  %v399_v55 = vrot.slane %v327_v51, 1  ;;  %v330_v59 = vld [vmem:[%s2067_s23 + $0xa0] sm:$0x1] }
  0x1e   : > { %1778 = vmatprep.mubr.msk.f32.mxu1 %vm406_vm0, %v2085_v15  ;;  %1796 = vmatpush3.msra.mxu0 %v2115_v29  ;;  %v393_v48 = vsel %vm370_vm1, %v391_v41, %v392_v42  ;;  %v395_v54 = vsel %vm370_vm1, %v392_v42, %v394_v47  ;;  %v401_v57 = vrot.slane %v2177_v52, 1  ;;  %v402_v58 = vrot.slane %v2180_v53, 1  ;;  %v333_v7 = vld [vmem:[%s2067_s23 + $0xb8] sm:$0x1]  ;;  %v334_v10 = vld [vmem:[%s299_s8] sm:$0xff]  ;;  %v335_v11 = vld [vmem:[%s299_s8 + $0x8] sm:$0xff] }
  0x1f   : > { %1751 = vmatmul.mubr.msk.f32.gmra.mxu0 %vm406_vm0, %v2124_v30  ;;  %1843 = vmatprep.subr.mxu0 %v2017_v0  ;;  %v398_v56 = vsel %vm370_vm1, %v396_v49, %v397_v50  ;;  %v400_v60 = vsel %vm370_vm1, %v397_v50, %v399_v55  ;;  %v404_v61 = vrot.slane %v330_v59, 1  ;;  %v892_v8 = vrot.slane %v333_v7, 1  ;;  %s1583_s14 = sshll.u32 %s307_s13, 3 }
  0x20   : > { %1753 = vmatprep.mubr.msk.f32.mxu0 %vm406_vm0, %v2129_v32  ;;  %1850 = vmatprep.subr.mxu1 %v2022_v1  ;;  %v403_v62 = vsel %vm370_vm1, %v401_v57, %v402_v58  ;;  %s309_s24 = scalar_lea.vmem %s2355_s4, %s1583_s14 }
  0x21   : > { %1779 = vmatmul.mubr.msk.f32.gmra.mxu1 %vm406_vm0, %v2092_v19  ;;  %v405_v63 = vsel %vm370_vm1, %v402_v58, %v404_v61 }
  0x22   : > { %1781 = vmatprep.mubr.msk.f32.mxu1 %vm406_vm0, %v2107_v27 }
  0x23   : > { %1754 = vmatmul.mubr.msk.f32.gmra.mxu0 %vm406_vm0, %v385_v38 }
  0x24   : > { %1756 = vmatprep.mubr.msk.f32.mxu0 %vm406_vm0, %v388_v40 }
  0x25   : > { %1782 = vmatmul.mubr.msk.f32.gmra.mxu1 %vm406_vm0, %v2110_v28 }
  0x26   : > { %1784 = vmatprep.mubr.msk.f32.mxu1 %vm406_vm0, %v2139_v36 }
  0x27   : > { %1757 = vmatmul.mubr.msk.f32.gmra.mxu0 %vm406_vm0, %v390_v46 }
  0x28   : > { %1759 = vmatprep.mubr.msk.f32.mxu0 %vm406_vm0, %v393_v48 }
  0x29   : > { %1785 = vmatmul.mubr.msk.f32.gmra.mxu1 %vm406_vm0, %v2142_v37 }
  0x2a   : > { %1787 = vmatprep.mubr.msk.f32.mxu1 %vm406_vm0, %v2160_v44 }
  0x2b   : > { %1760 = vmatmul.mubr.msk.f32.gmra.mxu0 %vm406_vm0, %v395_v54 }
  0x2c   : > { %1762 = vmatprep.mubr.msk.f32.mxu0 %vm406_vm0, %v398_v56 }
  0x2d   : > { %1788 = vmatmul.mubr.msk.f32.gmra.mxu1 %vm406_vm0, %v2163_v45 }
  0x2e   : > { %1790 = vmatprep.mubr.msk.f32.mxu1 %vm406_vm0, %v2177_v52 }
  0x2f   : > { %1763 = vmatmul.mubr.msk.f32.gmra.mxu0 %vm406_vm0, %v400_v60 }
  0x30   : > { %1765 = vmatprep.mubr.msk.f32.mxu0 %vm406_vm0, %v403_v62 }
  0x31   : > { %1791 = vmatmul.mubr.msk.f32.gmra.mxu1 %vm406_vm0, %v2180_v53 }
  0x32   : > { %1822 = vmatprep.mubr.msk.f32.mxu1 %vm406_vm0, %v2104_v26 }
  0x33   : > { %1766 = vmatmul.mubr.msk.f32.gmra.mxu0 %vm406_vm0, %v405_v63 }
  0x34   : > { %1797 = vmatprep.mubr.msk.f32.mxu0 %vm406_vm0, %v2079_v13  ;;  %v1335_v13 = vrot.slane %v334_v10, 1 }
  0x35   : > { %1823 = vmatmul.mubr.msk.f32.vlgmr.msra.gmra.mxu1 %vm406_vm0, %v2124_v30 }
  0x36   : > { %1851 = vmatpush3.msra.mxu1 %v2022_v1  ;;  %1825 = vmatprep.mubr.msk.f32.mxu1 %vm406_vm0, %v2129_v32  ;;  %v332_v1 = vld [vmem:[%s2067_s23 + $0xb0] sm:$0xff] }
  0x37   : > { %1798 = vmatmul.mubr.msk.f32.vlgmr.msra.gmra.mxu0 %vm406_vm0, %v2082_v14  ;;  %1852 = vmatprep.subr.mxu1 %v2037_v3  ;;  %v1336_v14 = vrot.slane %v335_v11, 1 }
  0x38   : > { %1844 = vmatpush3.msra.mxu0 %v2017_v0  ;;  %1800 = vmatprep.mubr.msk.f32.mxu0 %vm406_vm0, %v2085_v15  ;;  %v331_v0 = vld [vmem:[%s2067_s23 + $0xa8] sm:$0xff]  ;;  %v336_v15 = vld [vmem:[%s299_s8 + $0x10] sm:$0x1] }
  0x39   : > { %1826 = vmatmul.mubr.msk.f32.gmra.mxu1 %vm406_vm0, %v385_v38  ;;  %1845 = vmatprep.subr.mxu0 %v2027_v2  ;;  %v1338_v16 = vrot.slane %v336_v15, 1  ;;  %v1337_v17 = vsel %vm370_vm1, %v1335_v13, %v1336_v14 }
  0x3a   : > { %1828 = vmatprep.mubr.msk.f32.mxu1 %vm406_vm0, %v388_v40  ;;  %1846 = vmatpush3.msra.mxu0 %v2027_v2  ;;  %v889_v2 = vrot.slane %v331_v0, 1 }
  0x3b   : > { %1801 = vmatmul.mubr.msk.f32.gmra.mxu0 %vm406_vm0, %v2092_v19  ;;  %1853 = vmatpush3.msra.mxu1 %v2037_v3  ;;  %v890_v3 = vrot.slane %v332_v1, 1  ;;  %v1339_v18 = vsel %vm370_vm1, %v1336_v14, %v1338_v16 }
  0x3c   : > { %1803 = vmatprep.mubr.msk.f32.mxu0 %vm406_vm0, %v2107_v27  ;;  %1857 = vmatprep.subr.mxu0 %v2047_v4 }
  0x3d   : > { %1829 = vmatmul.mubr.msk.f32.gmra.mxu1 %vm406_vm0, %v390_v46  ;;  %1864 = vmatprep.subr.mxu1 %v2052_v5  ;;  %v891_v9 = vsel %vm370_vm1, %v889_v2, %v890_v3  ;;  %v893_v12 = vsel %vm370_vm1, %v890_v3, %v892_v8 }
  0x3e   : > { %1831 = vmatprep.mubr.msk.f32.mxu1 %vm406_vm0, %v393_v48 }
  0x3f   : > { %1804 = vmatmul.mubr.msk.f32.gmra.mxu0 %vm406_vm0, %v2110_v28 }
  0x40   : > { %1806 = vmatprep.mubr.msk.f32.mxu0 %vm406_vm0, %v2139_v36 }
  0x41   : > { %1832 = vmatmul.mubr.msk.f32.gmra.mxu1 %vm406_vm0, %v395_v54 }
  0x42   : > { %1834 = vmatprep.mubr.msk.f32.mxu1 %vm406_vm0, %v398_v56 }
  0x43   : > { %1807 = vmatmul.mubr.msk.f32.gmra.mxu0 %vm406_vm0, %v2142_v37 }
  0x44   : > { %1809 = vmatprep.mubr.msk.f32.mxu0 %vm406_vm0, %v2160_v44 }
  0x45   : > { %1835 = vmatmul.mubr.msk.f32.gmra.mxu1 %vm406_vm0, %v400_v60 }
  0x46   : > { %1837 = vmatprep.mubr.msk.f32.mxu1 %vm406_vm0, %v403_v62  ;;  %v2294_v62 = vld [vmem:[%s2354_s3] ss:$0 sm:$0xff] }
  0x47   : > { %1810 = vmatmul.mubr.msk.f32.gmra.mxu0 %vm406_vm0, %v2163_v45 }
  0x48   : > { %1812 = vmatprep.mubr.msk.f32.mxu0 %vm406_vm0, %v2177_v52 }
  0x49   : > { %1838 = vmatmul.mubr.msk.f32.gmra.mxu1 %vm406_vm0, %v405_v63 }
  0x4a   : > { %1840 = vmatprep.mubr.msk.f32.mxu1 %vm406_vm0, %v891_v9 }
  0x4b   : > { %1813 = vmatmul.mubr.msk.f32.gmra.mxu0 %vm406_vm0, %v2180_v53 }
  0x4c   : > { %1815 = vmatprep.mubr.msk.f32.mxu0 %vm406_vm0, %v331_v0 }
  0x4d   : > { %1841 = vmatmul.mubr.msk.f32.gmra.mxu1 %vm406_vm0, %v893_v12 }
  0x4e   : > { %1854 = vmatprep.mubr.msk.f32.mxu1 %vm406_vm0, %v331_v0 }
  0x4f   : > { %1816 = vmatmul.mubr.msk.f32.gmra.mxu0 %vm406_vm0, %v332_v1 }
  0x50   : > { %1847 = vmatprep.mubr.msk.f32.mxu0 %vm406_vm0, %v891_v9 }
  0x51   : > { %1855 = vmatmul.mubr.msk.f32.vlgmr.msra.gmra.mxu1 %vm406_vm0, %v332_v1 }
  0x52   : > { %1865 = vmatpush3.msra.mxu1 %v2052_v5  ;;  %1868 = vmatprep.mubr.msk.f32.mxu1 %vm406_vm0, %v1337_v17 }
  0x53   : > { %1848 = vmatmul.mubr.msk.f32.vlgmr.msra.gmra.mxu0 %vm406_vm0, %v893_v12  ;;  %1866 = vmatprep.subr.mxu1 %v2072_v6 }
  0x54   : > { %1858 = vmatpush3.msra.mxu0 %v2047_v4  ;;  %1861 = vmatprep.mubr.msk.f32.mxu0 %vm406_vm0, %v334_v10 }
  0x55   : > { %1859 = vmatprep.subr.mxu0 %v2115_v29  ;;  %1867 = vmatpush3.msra.mxu1 %v2072_v6 }
  0x56   : > { %1860 = vmatpush3.msra.mxu0 %v2115_v29  ;;  %1869 = vmatmul.mubr.msk.f32.vlgmr.msra.gmra.mxu1 %vm406_vm0, %v1339_v18 }
  0x57   : > { %1862 = vmatmul.mubr.msk.f32.vlgmr.msra.gmra.mxu0 %vm406_vm0, %v335_v11 }
  0xd8   : > { %v1774_v5 = vpop.f32.mrf.mxu1 }
  0xda   : > { %v664_v19 = vpop.f32.mrf.mxu1 }
  0xdb   : > { %v1749_v20 = vpop.f32.mrf.mxu0 }
  0xdc   : > { %v670_v21 = vadd.f32 %v1774_v5, %v1749_v20 }
  0xdd   : > { %v501_v22 = vpop.f32.mrf.mxu0  ;;  %v1777_v23 = vpop.f32.mrf.mxu1 }
  0xde   : > { %v665_v24 = vadd.f32 %v664_v19, %v501_v22 }
  0xdf   : > { %v1752_v4 = vpop.f32.mrf.mxu0  ;;  %v674_v25 = vpop.f32.mrf.mxu1 }
  0xe0   : > { %v680_v26 = vadd.f32 %v1777_v23, %v1752_v4 }
  0xe1   : > { %v511_v27 = vpop.f32.mrf.mxu0  ;;  %v1780_v28 = vpop.f32.mrf.mxu1 }
  0xe2   : > { %v675_v30 = vadd.f32 %v674_v25, %v511_v27 }
  0xe3   : > { %v1755_v6 = vpop.f32.mrf.mxu0  ;;  %v684_v31 = vpop.f32.mrf.mxu1 }
  0xe4   : > { %v690_v29 = vadd.f32 %v1780_v28, %v1755_v6 }
  0xe5   : > { %v521_v32 = vpop.f32.mrf.mxu0  ;;  %v1783_v33 = vpop.f32.mrf.mxu1 }
  0xe6   : > { %v685_v34 = vadd.f32 %v684_v31, %v521_v32 }
  0xe7   : > { %v1758_v35 = vpop.f32.mrf.mxu0  ;;  %v694_v36 = vpop.f32.mrf.mxu1 }
  0xe8   : > { %v700_v37 = vadd.f32 %v1783_v33, %v1758_v35 }
  0xe9   : > { %v531_v38 = vpop.f32.mrf.mxu0  ;;  %v1786_v39 = vpop.f32.mrf.mxu1 }
  0xea   : > { %v695_v40 = vadd.f32 %v694_v36, %v531_v38 }
  0xeb   : > { %v1761_v41 = vpop.f32.mrf.mxu0  ;;  %v704_v42 = vpop.f32.mrf.mxu1 }
  0xec   : > { %v710_v43 = vadd.f32 %v1786_v39, %v1761_v41 }
  0xed   : > { %v541_v44 = vpop.f32.mrf.mxu0  ;;  %v1789_v45 = vpop.f32.mrf.mxu1 }
  0xee   : > { %v705_v46 = vadd.f32 %v704_v42, %v541_v44 }
  0xef   : > { %v1764_v47 = vpop.f32.mrf.mxu0  ;;  %v714_v48 = vpop.f32.mrf.mxu1 }
  0xf0   : > { %v720_v49 = vadd.f32 %v1789_v45, %v1764_v47 }
  0xf1   : > { %v551_v50 = vpop.f32.mrf.mxu0  ;;  %v1792_v51 = vpop.f32.mrf.mxu1 }
  0xf2   : > { %v2285_v52 = vadd.f32 %v714_v48, %v551_v50 }
  0xf3   : > { %v1767_v53 = vpop.f32.mrf.mxu0  ;;  %v724_v54 = vpop.f32.mrf.mxu1 }
  0xf4   : > { %v2287_v55 = vadd.f32 %v1792_v51, %v1767_v53 }
  0xf5   : > { %v561_v56 = vpop.f32.mrf.mxu0  ;;  %v1824_v57 = vpop.f32.mrf.mxu1 }
  0xf6   : > { %v2289_v58 = vadd.f32 %v724_v54, %v561_v56 }
  0xf7   : > { %v1799_v59 = vpop.f32.mrf.mxu0  ;;  %v964_v60 = vpop.f32.mrf.mxu1 }
  0xf8   : > { %v875_v61 = vadd.f32 %v1799_v59, %v670_v21 }
  0xf9   : > { %v805_v63 = vpop.f32.mrf.mxu0  ;;  %v1827_v0 = vpop.f32.mrf.mxu1 }
  0xfa   : > { %v1034_v1 = vadd.f32 %v1824_v57, %v875_v61  ;;  %v874_v2 = vadd.f32 %v805_v63, %v665_v24 }
  0xfb   : > { %v1802_v3 = vpop.f32.mrf.mxu0  ;;  %v974_v7 = vpop.f32.mrf.mxu1 }
  0xfc   : > { %v2297_v8 = vadd.f32 %v2294_v62, %v1034_v1  ;;  %v1033_v9 = vadd.f32 %v964_v60, %v874_v2  ;;  %v877_v10 = vadd.f32 %v1802_v3, %v680_v26 }
  0xfd   : > { %v815_v11 = vpop.f32.mrf.mxu0  ;;  %v1830_v12 = vpop.f32.mrf.mxu1 }
  0xfe   : > { %v1036_v13 = vadd.f32 %v1827_v0, %v877_v10  ;;  %v876_v14 = vadd.f32 %v815_v11, %v675_v30  ;;  %v2300_v15 = vadd.f32 %v2294_v62, %v1033_v9 }
  0xff   : > { %v1805_v16 = vpop.f32.mrf.mxu0  ;;  %v984_v17 = vpop.f32.mrf.mxu1 }
 0x100   : > { %v2303_v18 = vadd.f32 %v2294_v62, %v1036_v13  ;;  %v1035_v5 = vadd.f32 %v974_v7, %v876_v14  ;;  %v879_v19 = vadd.f32 %v1805_v16, %v690_v29 }
 0x101   : > { %v825_v20 = vpop.f32.mrf.mxu0  ;;  %v1833_v21 = vpop.f32.mrf.mxu1 }
 0x102   : > { %v2306_v22 = vadd.f32 %v2294_v62, %v1035_v5  ;;  %v1038_v23 = vadd.f32 %v1830_v12, %v879_v19  ;;  %v878_v24 = vadd.f32 %v825_v20, %v685_v34 }
 0x103   : > { %v1808_v4 = vpop.f32.mrf.mxu0  ;;  %v994_v25 = vpop.f32.mrf.mxu1 }
 0x104   : > { %v2309_v26 = vadd.f32 %v2294_v62, %v1038_v23  ;;  %v1037_v27 = vadd.f32 %v984_v17, %v878_v24  ;;  %v881_v28 = vadd.f32 %v1808_v4, %v700_v37 }
 0x105   : > { %v835_v30 = vpop.f32.mrf.mxu0  ;;  %v1836_v6 = vpop.f32.mrf.mxu1 }
 0x106   : > { %v1057_v31 = vadd.f32 %v2294_v62, %v1037_v27  ;;  %v1040_v32 = vadd.f32 %v1833_v21, %v881_v28  ;;  %v880_v29 = vadd.f32 %v835_v30, %v695_v40 }
 0x107   : > { %v1811_v33 = vpop.f32.mrf.mxu0  ;;  %v1004_v35 = vpop.f32.mrf.mxu1 }
 0x108   : > { %v1060_v36 = vadd.f32 %v2294_v62, %v1040_v32  ;;  %v1039_v38 = vadd.f32 %v994_v25, %v880_v29  ;;  %v883_v39 = vadd.f32 %v1811_v33, %v710_v43 }
 0x109   : > { %v845_v34 = vpop.f32.mrf.mxu0  ;;  %v1839_v41 = vpop.f32.mrf.mxu1 }
 0x10a   : > { %v1059_v42 = vadd.f32 %v2294_v62, %v1039_v38  ;;  %v1042_v44 = vadd.f32 %v1836_v6, %v883_v39  ;;  %v882_v45 = vadd.f32 %v845_v34, %v705_v46 }
 0x10b   : > { %v1814_v47 = vpop.f32.mrf.mxu0  ;;  %v1014_v37 = vpop.f32.mrf.mxu1 }
 0x10c   : > { %v1062_v48 = vadd.f32 %v2294_v62, %v1042_v44  ;;  %v1041_v50 = vadd.f32 %v1004_v35, %v882_v45  ;;  %v885_v51 = vadd.f32 %v1814_v47, %v720_v49 }
 0x10d   : > { %v855_v53 = vpop.f32.mrf.mxu0  ;;  %v1842_v40 = vpop.f32.mrf.mxu1 }
 0x10e   : > { %v1061_v54 = vadd.f32 %v2294_v62, %v1041_v50  ;;  %v1044_v56 = vadd.f32 %v1839_v41, %v885_v51  ;;  %v884_v57 = vadd.f32 %v855_v53, %v2285_v52 }
 0x10f   : > { %v1817_v43 = vpop.f32.mrf.mxu0  ;;  %v1024_v59 = vpop.f32.mrf.mxu1 }
 0x110   : > { %v1064_v60 = vadd.f32 %v2294_v62, %v1044_v56  ;;  %v1043_v61 = vadd.f32 %v1014_v37, %v884_v57  ;;  %v887_v46 = vadd.f32 %v1817_v43, %v2287_v55 }
 0x111   : > { %v865_v63 = vpop.f32.mrf.mxu0  ;;  %v1856_v0 = vpop.f32.mrf.mxu1 }
 0x112   : > { %v1063_v1 = vadd.f32 %v2294_v62, %v1043_v61  ;;  %v1046_v2 = vadd.f32 %v1842_v40, %v887_v46  ;;  %v886_v49 = vadd.f32 %v865_v63, %v2289_v58 }
 0x113   : > { %v1849_v3 = vpop.f32.mrf.mxu0  ;;  %v1242_v7 = vpop.f32.mrf.mxu1 }
 0x114   : > { %v1066_v9 = vadd.f32 %v2294_v62, %v1046_v2  ;;  %v1045_v10 = vadd.f32 %v1024_v59, %v886_v49  ;;  %v1248_v14 = vadd.f32 %v1856_v0, %v1849_v3 }
 0x115   : > { %v1167_v52 = vpop.f32.mrf.mxu0 }
 0x116   : > { %v1065_v11 = vadd.f32 %v2294_v62, %v1045_v10  ;;  %v1870_v13 = vpop.f32.mrf.mxu1  ;;  %v1243_v16 = vadd.f32 %v1242_v7, %v1167_v52 }
 0x117   : > { %v1863_v12 = vpop.f32.mrf.mxu0 }
 0x118   : > { %v1333_v17 = vadd.f32 %v1863_v12, %v1248_v14  ;;  %v1410_v19 = vpop.f32.mrf.mxu1 }
 0x119   : > { %v1323_v55 = vpop.f32.mrf.mxu0 }
 0x11a   : > { %v1332_v5 = vadd.f32 %v1323_v55, %v1243_v16  ;;  %v1420_v21 = vadd.f32 %v1870_v13, %v1333_v17 }
 0x11c   : > { %v1419_v20 = vadd.f32 %v1410_v19, %v1332_v5  ;;  %v1422_v23 = vadd.f32 %v2294_v62, %v1420_v21 }
 0x11e   : > { %v1421_v58 = vadd.f32 %v2294_v62, %v1419_v20 }
 0x120   : > { %1423 = vxpose.xlu0.b32.start [1/2] (short) (narrow) %v1421_v58, 8 }
 0x124   : > { %1424 = vxpose.xlu0.b32.end [2/2] (short) (narrow) %v1422_v23, 8 }
 0x19c   : > { %v1439_v24 = vpop.trf.xlu0 }
 0x19d   : > { %1456 = vrot.lane.b32.xlu1 %v1439_v24, %s1956_s11 }
 0x1c6   : > { %1067 = vxpose.xlu1.b32.start [1/14] (short) (narrow) %v2300_v15, 8 }
 0x1ca   : > { %1068 = vxpose.xlu1.b32.cont [2/14] (short) (narrow) %v2297_v8, 8 }
 0x1ce   : > { %1069 = vxpose.xlu1.b32.cont [3/14] (short) (narrow) %v2306_v22, 8 }
 0x1d2   : > { %1070 = vxpose.xlu1.b32.cont [4/14] (short) (narrow) %v2303_v18, 8 }
 0x1d6   : > { %1071 = vxpose.xlu1.b32.cont [5/14] (short) (narrow) %v1057_v31, 8 }
 0x1da   : > { %1072 = vxpose.xlu1.b32.cont [6/14] (short) (narrow) %v2309_v26, 8 }
 0x1de   : > { %1073 = vxpose.xlu1.b32.cont [7/14] (short) (narrow) %v1059_v42, 8 }
 0x1e2   : > { %1074 = vxpose.xlu1.b32.cont [8/14] (short) (narrow) %v1060_v36, 8 }
 0x1e6   : > { %1075 = vxpose.xlu1.b32.cont [9/14] (short) (narrow) %v1061_v54, 8 }
 0x1ea   : > { %1076 = vxpose.xlu1.b32.cont [10/14] (short) (narrow) %v1062_v48, 8 }
 0x1ee   : > { %1077 = vxpose.xlu1.b32.cont [11/14] (short) (narrow) %v1063_v1, 8 }
 0x1f2   : > { %1078 = vxpose.xlu1.b32.cont [12/14] (short) (narrow) %v1064_v60, 8 }
 0x1f6   : > { %1079 = vxpose.xlu1.b32.cont [13/14] (short) (narrow) %v1065_v11, 8 }
 0x1fa   : > { %1080 = vxpose.xlu1.b32.end [14/14] (short) (narrow) %v1066_v9, 8 }
 0x20f   : > { %v1457_v62 = vpop.permute.xlu1 %1456 }
 0x242   : > { %v1083_v8 = vpop.trf.xlu1 }
 0x243   : > { %1100 = vst.msk [vmem:[%s309_s24] sm:$0xff] %vm1099_vm2, %v1083_v8 }
 0x244   : > { %1460 = vst.msk [vmem:[%s309_s24] sm:$0xff] %vm1459_vm3, %v1457_v62 }
 0x245 PF: > { %s14_s19 = sadd.s32 1, %s1954_s19   ;;  %s2356_s15 = smov %s1946_s17 }
 0x246   : > { %p11_p9 = scmp.ge.s32.totalorder %s14_s19, 6   ;;  %s2357_s16 = smov %s1950_s18 }
 0x247   : > { %s2358_s17 = smov %s2361_s20  ;;  %s2359_s18 = smov %s2365_s21 }
 0x248   :  { %13 = sbr.rel (!%p11_p9) target bundleno = 3 (0x3), region = 72 }

</bundles_post_ra>
